<compile_context>
chip_gen: v7x
topology: tpu7x:2x2x1
jax: 0.10.0
libtpu: 0.0.40
codegen_flags: <defaults>
</compile_context>

<pallas_src>
from functools import partial

import numpy as np
import jax
import jax.numpy as jnp
from jax.experimental import pallas as pl
from jax.experimental.pallas import tpu as pltpu


def _access_delay_kernel(data_t_ref, place_ref, out_ref):
    """Per-tile nearest-placement Euclidean distance.

    data_t_ref: (2, TM)  f32  transposed data tile (row 0 = x, row 1 = y)
    place_ref:  (Kp, 2)  f32  placements, padded rows set to +inf
    out_ref:    (1, TM)  f32  min distance of each data point in the tile
    """
    dx = data_t_ref[0:1, :]            # (1, TM)
    dy = data_t_ref[1:2, :]            # (1, TM)
    px = place_ref[:, 0:1]             # (Kp, 1)
    py = place_ref[:, 1:2]             # (Kp, 1)

    # Pairwise squared distances, K on sublanes, M on lanes.
    d2 = (dx - px) ** 2 + (dy - py) ** 2          # (Kp, TM)

    # Min over placements first (sublane reduce), then a single sqrt per point.
    min_d2 = jnp.min(d2, axis=0, keepdims=True)   # (1, TM)
    out_ref[...] = jnp.sqrt(min_d2)


@partial(jax.jit, static_argnames=("input_dim",))
def _placement_objective2_jit(x, data, input_dim):
    K = input_dim // 2
    placements = x.astype(jnp.float32).reshape(K, 2)
    data = data.astype(jnp.float32)
    M = data.shape[0]

    # K padded to a sublane multiple (min 8); M padded to lane multiples.
    Kp = max(((K + 7) // 8) * 8, 8)
    Mp0 = max(((M + 127) // 128) * 128, 128)

    # Keep the (Kp, TM) distance block around ~16 vregs (64 KiB f32) so it
    # never spills; same budget works on v5e/v6e/v7x (vreg file is identical).
    # TODO(synk): very large K would additionally want a K grid axis.
    tm_cap = max(128, ((16 * 1024) // Kp) // 128 * 128)
    TM = min(Mp0, tm_cap, 2048)
    num_tiles = -(-Mp0 // TM)
    Mp = num_tiles * TM

    # Placements: padded rows at +inf so they never win the min.
    place_pad = jnp.full((Kp, 2), jnp.inf, dtype=jnp.float32)
    place_pad = place_pad.at[:K, :].set(placements)

    # Data transposed so the M axis is lane-dense; padded tail lanes are
    # sliced off in the epilogue (no in-kernel mask needed).
    data_t = jnp.zeros((2, Mp), jnp.float32).at[:, :M].set(data.T)

    min_d = pl.pallas_call(
        _access_delay_kernel,
        out_shape=jax.ShapeDtypeStruct((1, Mp), jnp.float32),
        grid=(num_tiles,),
        in_specs=[
            pl.BlockSpec((2, TM), lambda i: (0, i)),
            pl.BlockSpec((Kp, 2), lambda i: (0, 0)),
        ],
        out_specs=pl.BlockSpec((1, TM), lambda i: (0, i)),
        compiler_params=pltpu.CompilerParams(
            dimension_semantics=("parallel",),
        ),
    )(data_t, place_pad)

    # Masked mean over the M valid data points (static slice, trivial epilogue).
    total = jnp.sum(min_d[0, :M])
    return (total / jnp.float32(M)).reshape(1, 1)


def placement_objective2_forward(x, data, input_dim):
    """JAX/Pallas equivalent of PlacementObjective2.forward.

    x:    flat placement vector of length input_dim (K*2 coordinates)
    data: (M, 2) data/user points
    Returns a numpy (1, 1) float64 array, matching the torch module's output.
    """
    out = _placement_objective2_jit(
        jnp.asarray(x), jnp.asarray(data), int(input_dim)
    )
    out = jax.block_until_ready(out)
    return np.asarray(out, dtype=np.float64).reshape(1, 1)


def _reference(x, data, input_dim):
    K = input_dim // 2
    p = np.asarray(x, np.float64).reshape(K, 2)
    d = np.asarray(data, np.float64)
    dist = np.sqrt(((d[:, None, :] - p[None, :, :]) ** 2).sum(-1))  # (M, K)
    return np.array([[dist.min(axis=1).mean()]], dtype=np.float64)


if __name__ == "__main__":
    key = jax.random.PRNGKey(0)
    k1, k2 = jax.random.split(key)

    input_dim = 8          # -> K = 4 placement points, each (x, y)
    M = 16                 # number of data / user points

    x = jax.random.uniform(k1, (input_dim,), dtype=jnp.float32)   # flat placements
    data = jax.random.uniform(k2, (M, 2), dtype=jnp.float32)      # user points

    result = placement_objective2_forward(x, data, input_dim)
    ref = _reference(np.asarray(x), np.asarray(data), input_dim)

    assert result.shape == (1, 1) and result.dtype == np.float64
    np.testing.assert_allclose(result, ref, rtol=1e-5, atol=1e-6)
    print("KERNEL_OK")
</pallas_src>

<mosaic_0001>
module attributes {stable_mosaic.version = 11 : i64} {
  func.func @_access_delay_kernel(%arg0: i32, %arg1: memref<2x128xf32, #tpu.memory_space<vmem>>, %arg2: memref<8x2xf32, #tpu.memory_space<vmem>>, %arg3: memref<1x128xf32, #tpu.memory_space<vmem>>) attributes {dimension_semantics = [#tpu.dimension_semantics<parallel>], iteration_bounds = array<i64: 1>, scalar_prefetch = 0 : i64, scratch_operands = 0 : i64, tpu.core_type = #tpu.core_type<tc>, window_params = [{transform_indices = @transform_0, window_bounds = array<i64: 2, 128>}, {pipeline_mode = #tpu.pipeline_mode<synchronous>, transform_indices = @transform_1, window_bounds = array<i64: 8, 2>}, {transform_indices = @transform_2, window_bounds = array<i64: 1, 128>}]} {
    %c0 = arith.constant 0 : index
    %c0_0 = arith.constant 0 : index
    %0 = vector.load %arg1[%c0, %c0_0] : memref<2x128xf32, #tpu.memory_space<vmem>>, vector<1x128xf32>
    %c1 = arith.constant 1 : index
    %c0_1 = arith.constant 0 : index
    %1 = vector.load %arg1[%c1, %c0_1] : memref<2x128xf32, #tpu.memory_space<vmem>>, vector<1x128xf32>
    %c0_2 = arith.constant 0 : index
    %c0_3 = arith.constant 0 : index
    %2 = vector.load %arg2[%c0_2, %c0_3] : memref<8x2xf32, #tpu.memory_space<vmem>>, vector<8x1xf32>
    %c0_4 = arith.constant 0 : index
    %c1_5 = arith.constant 1 : index
    %3 = vector.load %arg2[%c0_4, %c1_5] : memref<8x2xf32, #tpu.memory_space<vmem>>, vector<8x1xf32>
    %4 = vector.broadcast %0 : vector<1x128xf32> to vector<8x128xf32>
    %5 = vector.broadcast %2 : vector<8x1xf32> to vector<8x128xf32>
    %6 = arith.subf %4, %5 : vector<8x128xf32>
    %7 = arith.mulf %6, %6 : vector<8x128xf32>
    %8 = vector.broadcast %1 : vector<1x128xf32> to vector<8x128xf32>
    %9 = vector.broadcast %3 : vector<8x1xf32> to vector<8x128xf32>
    %10 = arith.subf %8, %9 : vector<8x128xf32>
    %11 = arith.mulf %10, %10 : vector<8x128xf32>
    %12 = arith.addf %7, %11 : vector<8x128xf32>
    %cst = arith.constant dense<0x7F800000> : vector<128xf32>
    %13 = vector.multi_reduction <minimumf>, %12, %cst [0] : vector<8x128xf32> to vector<128xf32>
    %14 = vector.shape_cast %13 : vector<128xf32> to vector<1x128xf32>
    %15 = math.sqrt %14 : vector<1x128xf32>
    %c0_6 = arith.constant 0 : index
    %c0_7 = arith.constant 0 : index
    %16 = vector.load %arg3[%c0_6, %c0_7] : memref<1x128xf32, #tpu.memory_space<vmem>>, vector<1x128xf32>
    tpu.vector_store %arg3[%c0_6, %c0_7], %15 {strides = array<i32>} : memref<1x128xf32, #tpu.memory_space<vmem>>, vector<1x128xf32>,
    return
  }
  func.func @transform_0(%arg0: i32) -> (i32, i32) {
    %c0_i32 = arith.constant 0 : i32
    %c0_i32_0 = arith.constant 0 : i32
    return %c0_i32, %arg0 : i32, i32
  }
  func.func @transform_1(%arg0: i32) -> (i32, i32) {
    %c0_i32 = arith.constant 0 : i32
    %c0_i32_0 = arith.constant 0 : i32
    %c0_i32_1 = arith.constant 0 : i32
    return %c0_i32, %c0_i32_0 : i32, i32
  }
  func.func @transform_2(%arg0: i32) -> (i32, i32) {
    %c0_i32 = arith.constant 0 : i32
    %c0_i32_0 = arith.constant 0 : i32
    return %c0_i32, %arg0 : i32, i32
  }
}

</mosaic_0001>

<bundles_post_ra>
// kernel: _placement_objective2_jit.1
= control target key start
LH: loop header
LB: loop body
LE: loop exit
PB: predicated region body
PF: predicated region fallthrough
CT: control target
= control target key end

     0   :  { %v62_v0 = vmov 0   ;;  %v63_v2 = vmov 1   ;;  %s91_s1 = inlined_call_operand.vmem [shape: f32[8,2], index: 1, kind: input, shape index: {}]   ;;  %s92_s0 = inlined_call_operand.vmem [shape: f32[2,128], index: 0, kind: input, shape index: {}]   ;;  %s93_s2 = inlined_call_operand.vmem [shape: f32[1,128], index: 2, kind: output, shape index: {}]  }
   0x1   :  { %58 = vset.pattern.permute.xlu0 %v62_v0  ;;  %v13_v1 = vld [vmem:[%s91_s1] sm:$0xff] }
   0x2   :  { %20 = vperm.xlu0 %58, %v13_v1   ;;  %v54_v4 = vld [vmem:[%s92_s0] ss:$0 sm:$0xff]  ;;  %v55_v5 = vld [vmem:[%s92_s0 + $0x1] ss:$0 sm:$0xff] }
   0x6   :  { %59 = vset.pattern.permute.xlu0 %v63_v2 }
   0x7   :  { %30 = vperm.xlu0 %59, %v13_v1  }
  0x81   :  { %v21_v3 = vpop.permute.xlu0 %20 }
  0x82   :  { %v23_v6 = vsub.f32 %v54_v4, %v21_v3 }
  0x84   :  { %v24_v9 = vmul.f32 %v23_v6, %v23_v6 }
  0x86   :  { %v31_v7 = vpop.permute.xlu0 %30 }
  0x87   :  { %v33_v8 = vsub.f32 %v55_v5, %v31_v7 }
  0x89   :  { %v34_v10 = vmul.f32 %v33_v8, %v33_v8 }
  0x8b   :  { %v35_v11 = vadd.f32 %v34_v10, %v24_v9 }
  0x8d   :  { %v36_v12 = vrot.slane %v35_v11, 4 }
  0x8f   :  { %v37_v13 = vmin.f32 %v35_v11, %v36_v12 }
  0x91   :  { %v38_v14 = vrot.slane %v37_v13, 2 }
  0x93   :  { %v39_v15 = vmin.f32 %v37_v13, %v38_v14 }
  0x95   :  { %v40_v16 = vrot.slane %v39_v15, 1 }
  0x97   :  { %v41_v17 = vmin.f32 %v39_v15, %v40_v16 }
  0x99   :  { %60 = vrsqrt.f32 %v41_v17  ;;  %vm44_vm0 = vcmp.eq.f32.partialorder %v41_v17, inf  ;;  %v47_v20 = vand.u32 2147483648, %v41_v17  ;;  %vm46_vm1 = vcmp.eq.f32.partialorder %v41_v17, 0.0 }
  0xa3   :  { %v61_v18 = vpop.eup %60 }
  0xa4   :  { %v43_v19 = vmul.f32 %v61_v18, %v41_v17 }
  0xa6   :  { %v45_v21 = vsel %vm44_vm0, %v41_v17, %v43_v19 }
  0xa7   :  { %v48_v22 = vsel %vm46_vm1, %v47_v20, %v45_v21 }
  0xa8   :  { %49 = vst [vmem:[%s93_s2] sm:$0x1] %v48_v22 }

</bundles_post_ra>
